<compile_context>
chip_gen: v6e
topology: v6e:2x2x1
jax: 0.10.0
libtpu: 0.0.40
codegen_flags: <defaults>
</compile_context>

<pallas_src>
import functools

import jax
import jax.numpy as jnp
import numpy as np
from jax.experimental import pallas as pl
from jax.experimental.pallas import tpu as pltpu

# ---- problem sizes (small, consistent with the module) ----------------------
VOCAB_SIZE = 256
EMBED_DIM = 128
CONTEXT_SIZE = 4
N_CTX = 2 * CONTEXT_SIZE   # context word indices per example
BATCH = 16                 # independent examples per pallas_call
TILE_B = 8                 # examples per grid step (sublane-aligned)


def cbow_kernel(idx_ref, emb_ref, w_ref, b_ref, out_ref, *, n_ctx):
    """One batch-tile of the CBOW forward.

    idx_ref : VMEM (TB, n_ctx) int32  context word ids for TB examples
    emb_ref : VMEM (V, D)      f32    embedding table (resident across grid)
    w_ref   : VMEM (D, V)      f32    linear weight, pre-transposed, scale-folded
    b_ref   : VMEM (1, V)      f32    linear bias
    out_ref : VMEM (TB, V)     f32    per-example log-probs
    """
    tb, v = out_ref.shape

    # --- Per-example vocab counts (multi-hot with multiplicity) from the
    # --- context ids: n_ctx VPU compare+adds against a lane iota.  This fuses
    # --- the embedding gather + sum-pool into a single MXU matmul below.
    idx = idx_ref[...]                                              # (TB, n_ctx)
    iota_v = jax.lax.broadcasted_iota(jnp.int32, (tb, v), 1)        # (TB, V)
    counts = jnp.zeros((tb, v), jnp.float32)
    for i in range(n_ctx):                                          # static unroll
        counts = counts + (iota_v == idx[:, i:i + 1]).astype(jnp.float32)

    # --- Gather + sum-pool:  (TB, V) @ (V, D) on the MXU.
    pooled = jnp.dot(counts, emb_ref[...], preferred_element_type=jnp.float32)

    # --- Linear layer:  (TB, D) @ (D, V) + b.  The 1/context_size scale is
    # --- already folded into w_ref at parameter-prep time.
    logits = jnp.dot(pooled, w_ref[...], preferred_element_type=jnp.float32)
    logits = logits + b_ref[...]

    # --- Numerically-stable log_softmax along the vocab dim.
    m = jnp.max(logits, axis=1, keepdims=True)
    shifted = logits - m
    lse = jnp.log(jnp.sum(jnp.exp(shifted), axis=1, keepdims=True))
    out_ref[...] = shifted - lse


def prepare_linear_weight(lin_w, context_size):
    """One-time (parameter-init-time) prep: (V, D) -> (D, V) / context_size."""
    return (lin_w.T / context_size).astype(jnp.float32)


def cbow_forward(indices, emb_table, w_prepped, lin_b, *, tile_b=TILE_B):
    """Batched CBOW forward.

    indices   : (B, n_ctx) or (n_ctx,) int32   independent contexts
    emb_table : (V, D) f32
    w_prepped : (D, V) f32   = lin_w.T / context_size  (prepare_linear_weight)
    lin_b     : (V,)  f32
    returns   : (B, V) f32   log-probs per example
    """
    indices = jnp.asarray(indices, jnp.int32)
    if indices.ndim == 1:
        indices = indices[None, :]            # original single-example forward()
    b, n_ctx = indices.shape
    v, d = emb_table.shape

    # Pad the batch up to a multiple of the sublane-aligned tile.
    b_pad = ((b + tile_b - 1) // tile_b) * tile_b
    if b_pad != b:
        indices = jnp.pad(indices, ((0, b_pad - b), (0, 0)))

    bias2 = lin_b.reshape(1, v)               # metadata-only reshape

    kernel = functools.partial(cbow_kernel, n_ctx=n_ctx)

    out = pl.pallas_call(
        kernel,
        out_shape=jax.ShapeDtypeStruct((b_pad, v), jnp.float32),
        grid_spec=pltpu.PrefetchScalarGridSpec(
            num_scalar_prefetch=0,
            grid=(b_pad // tile_b,),
            in_specs=[
                pl.BlockSpec((tile_b, n_ctx), lambda i: (i, 0)),   # ids per tile
                pl.BlockSpec((v, d), lambda i: (0, 0)),            # emb (resident)
                pl.BlockSpec((d, v), lambda i: (0, 0)),            # W^T/c (resident)
                pl.BlockSpec((1, v), lambda i: (0, 0)),            # bias (resident)
            ],
            out_specs=pl.BlockSpec((tile_b, v), lambda i: (i, 0)),
        ),
        compiler_params=pltpu.CompilerParams(
            dimension_semantics=("parallel",),   # both v7x TCs split the batch
        ),
    )(indices, emb_table, w_prepped, bias2)

    return out[:b]


def cbow_reference(indices, emb_table, lin_w, lin_b, *, context_size):
    embeds = emb_table[indices]                               # (B, n_ctx, D)
    pooled = jnp.sum(embeds, axis=1) / context_size           # (B, D)
    logits = pooled @ lin_w.T + lin_b                         # (B, V)
    return jax.nn.log_softmax(logits, axis=-1)


if __name__ == "__main__":
    key = jax.random.PRNGKey(0)
    k_idx, k_emb, k_w, k_b = jax.random.split(key, 4)

    # Deterministic "parameters" (synthetic init, shapes per the module).
    emb_table = jax.random.normal(k_emb, (VOCAB_SIZE, EMBED_DIM), jnp.float32)
    bound = 1.0 / np.sqrt(EMBED_DIM)
    lin_w = jax.random.uniform(k_w, (VOCAB_SIZE, EMBED_DIM), jnp.float32,
                               minval=-bound, maxval=bound)
    lin_b = jax.random.uniform(k_b, (VOCAB_SIZE,), jnp.float32,
                               minval=-bound, maxval=bound)

    # One-time parameter prep (init-time, not per call).
    w_prepped = prepare_linear_weight(lin_w, CONTEXT_SIZE)

    # A small batch of contexts (each row == one PyTorch forward() call).
    indices = jax.random.randint(k_idx, (BATCH, N_CTX), 0, VOCAB_SIZE, jnp.int32)

    log_probs = cbow_forward(indices, emb_table, w_prepped, lin_b)
    log_probs = jax.block_until_ready(log_probs)

    ref = cbow_reference(indices, emb_table, lin_w, lin_b,
                         context_size=CONTEXT_SIZE)
    assert log_probs.shape == (BATCH, VOCAB_SIZE)
    np.testing.assert_allclose(np.asarray(log_probs), np.asarray(ref),
                               rtol=1e-5, atol=1e-5)

    # Also exercise the original single-example forward() path (batch of 1).
    single = cbow_forward(indices[0], emb_table, w_prepped, lin_b)
    single = jax.block_until_ready(single)
    assert single.shape == (1, VOCAB_SIZE)
    np.testing.assert_allclose(np.asarray(single), np.asarray(ref[:1]),
                               rtol=1e-5, atol=1e-5)

    print("KERNEL_OK")
</pallas_src>

<mosaic_0001>
module attributes {stable_mosaic.version = 11 : i64} {
  func.func @cbow_kernel(%arg0: i32, %arg1: memref<8x8xi32, #tpu.memory_space<vmem>>, %arg2: memref<256x128xf32, #tpu.memory_space<vmem>>, %arg3: memref<128x256xf32, #tpu.memory_space<vmem>>, %arg4: memref<1x256xf32, #tpu.memory_space<vmem>>, %arg5: memref<8x256xf32, #tpu.memory_space<vmem>>) attributes {dimension_semantics = [#tpu.dimension_semantics<parallel>], iteration_bounds = array<i64: 2>, scalar_prefetch = 0 : i64, scratch_operands = 0 : i64, tpu.core_type = #tpu.core_type<tc>, window_params = [{transform_indices = @transform_0, window_bounds = array<i64: 8, 8>}, {pipeline_mode = #tpu.pipeline_mode<synchronous>, transform_indices = @transform_1, window_bounds = array<i64: 256, 128>}, {pipeline_mode = #tpu.pipeline_mode<synchronous>, transform_indices = @transform_2, window_bounds = array<i64: 128, 256>}, {pipeline_mode = #tpu.pipeline_mode<synchronous>, transform_indices = @transform_3, window_bounds = array<i64: 1, 256>}, {transform_indices = @transform_4, window_bounds = array<i64: 8, 256>}]} {
    %c0 = arith.constant 0 : index
    %c0_0 = arith.constant 0 : index
    %0 = vector.load %arg1[%c0, %c0_0] : memref<8x8xi32, #tpu.memory_space<vmem>>, vector<8x8xi32>
    %1 = tpu.iota {dimensions = array<i32: 1>} : vector<8x256xi32>
    %cst = arith.constant 0.000000e+00 : f32
    %2 = vector.broadcast %cst : f32 to vector<8x256xf32>
    %3 = vector.extract_strided_slice %0 {offsets = [0, 0], sizes = [8, 1], strides = [1, 1]} : vector<8x8xi32> to vector<8x1xi32>
    %4 = vector.broadcast %3 : vector<8x1xi32> to vector<8x256xi32>
    %5 = arith.cmpi eq, %1, %4 : vector<8x256xi32>
    %6 = arith.extui %5 : vector<8x256xi1> to vector<8x256xi32>
    %7 = arith.sitofp %6 : vector<8x256xi32> to vector<8x256xf32>
    %8 = arith.addf %2, %7 : vector<8x256xf32>
    %9 = vector.extract_strided_slice %0 {offsets = [0, 1], sizes = [8, 1], strides = [1, 1]} : vector<8x8xi32> to vector<8x1xi32>
    %10 = vector.broadcast %9 : vector<8x1xi32> to vector<8x256xi32>
    %11 = arith.cmpi eq, %1, %10 : vector<8x256xi32>
    %12 = arith.extui %11 : vector<8x256xi1> to vector<8x256xi32>
    %13 = arith.sitofp %12 : vector<8x256xi32> to vector<8x256xf32>
    %14 = arith.addf %8, %13 : vector<8x256xf32>
    %15 = vector.extract_strided_slice %0 {offsets = [0, 2], sizes = [8, 1], strides = [1, 1]} : vector<8x8xi32> to vector<8x1xi32>
    %16 = vector.broadcast %15 : vector<8x1xi32> to vector<8x256xi32>
    %17 = arith.cmpi eq, %1, %16 : vector<8x256xi32>
    %18 = arith.extui %17 : vector<8x256xi1> to vector<8x256xi32>
    %19 = arith.sitofp %18 : vector<8x256xi32> to vector<8x256xf32>
    %20 = arith.addf %14, %19 : vector<8x256xf32>
    %21 = vector.extract_strided_slice %0 {offsets = [0, 3], sizes = [8, 1], strides = [1, 1]} : vector<8x8xi32> to vector<8x1xi32>
    %22 = vector.broadcast %21 : vector<8x1xi32> to vector<8x256xi32>
    %23 = arith.cmpi eq, %1, %22 : vector<8x256xi32>
    %24 = arith.extui %23 : vector<8x256xi1> to vector<8x256xi32>
    %25 = arith.sitofp %24 : vector<8x256xi32> to vector<8x256xf32>
    %26 = arith.addf %20, %25 : vector<8x256xf32>
    %27 = vector.extract_strided_slice %0 {offsets = [0, 4], sizes = [8, 1], strides = [1, 1]} : vector<8x8xi32> to vector<8x1xi32>
    %28 = vector.broadcast %27 : vector<8x1xi32> to vector<8x256xi32>
    %29 = arith.cmpi eq, %1, %28 : vector<8x256xi32>
    %30 = arith.extui %29 : vector<8x256xi1> to vector<8x256xi32>
    %31 = arith.sitofp %30 : vector<8x256xi32> to vector<8x256xf32>
    %32 = arith.addf %26, %31 : vector<8x256xf32>
    %33 = vector.extract_strided_slice %0 {offsets = [0, 5], sizes = [8, 1], strides = [1, 1]} : vector<8x8xi32> to vector<8x1xi32>
    %34 = vector.broadcast %33 : vector<8x1xi32> to vector<8x256xi32>
    %35 = arith.cmpi eq, %1, %34 : vector<8x256xi32>
    %36 = arith.extui %35 : vector<8x256xi1> to vector<8x256xi32>
    %37 = arith.sitofp %36 : vector<8x256xi32> to vector<8x256xf32>
    %38 = arith.addf %32, %37 : vector<8x256xf32>
    %39 = vector.extract_strided_slice %0 {offsets = [0, 6], sizes = [8, 1], strides = [1, 1]} : vector<8x8xi32> to vector<8x1xi32>
    %40 = vector.broadcast %39 : vector<8x1xi32> to vector<8x256xi32>
    %41 = arith.cmpi eq, %1, %40 : vector<8x256xi32>
    %42 = arith.extui %41 : vector<8x256xi1> to vector<8x256xi32>
    %43 = arith.sitofp %42 : vector<8x256xi32> to vector<8x256xf32>
    %44 = arith.addf %38, %43 : vector<8x256xf32>
    %45 = vector.extract_strided_slice %0 {offsets = [0, 7], sizes = [8, 1], strides = [1, 1]} : vector<8x8xi32> to vector<8x1xi32>
    %46 = vector.broadcast %45 : vector<8x1xi32> to vector<8x256xi32>
    %47 = arith.cmpi eq, %1, %46 : vector<8x256xi32>
    %48 = arith.extui %47 : vector<8x256xi1> to vector<8x256xi32>
    %49 = arith.sitofp %48 : vector<8x256xi32> to vector<8x256xf32>
    %50 = arith.addf %44, %49 : vector<8x256xf32>
    %c0_1 = arith.constant 0 : index
    %c0_2 = arith.constant 0 : index
    %51 = vector.load %arg2[%c0_1, %c0_2] : memref<256x128xf32, #tpu.memory_space<vmem>>, vector<256x128xf32>
    %cst_3 = arith.constant dense<0.000000e+00> : vector<8x128xf32>
    %52 = tpu.matmul %50, %51, %cst_3 {dimension_numbers = #tpu.dot_dimension_numbers<[1], [0], [0], [1], [0, 0, 1, 1], [], []>} : vector<8x256xf32>, vector<256x128xf32>, vector<8x128xf32> -> vector<8x128xf32>
    %c0_4 = arith.constant 0 : index
    %c0_5 = arith.constant 0 : index
    %53 = vector.load %arg3[%c0_4, %c0_5] : memref<128x256xf32, #tpu.memory_space<vmem>>, vector<128x256xf32>
    %cst_6 = arith.constant dense<0.000000e+00> : vector<8x256xf32>
    %54 = tpu.matmul %52, %53, %cst_6 {dimension_numbers = #tpu.dot_dimension_numbers<[1], [0], [0], [1], [0, 0, 1, 1], [], []>} : vector<8x128xf32>, vector<128x256xf32>, vector<8x256xf32> -> vector<8x256xf32>
    %c0_7 = arith.constant 0 : index
    %c0_8 = arith.constant 0 : index
    %55 = vector.load %arg4[%c0_7, %c0_8] : memref<1x256xf32, #tpu.memory_space<vmem>>, vector<1x256xf32>
    %56 = vector.broadcast %55 : vector<1x256xf32> to vector<8x256xf32>
    %57 = arith.addf %54, %56 : vector<8x256xf32>
    %cst_9 = arith.constant dense<0xFF800000> : vector<8xf32>
    %58 = vector.multi_reduction <maximumf>, %57, %cst_9 [1] : vector<8x256xf32> to vector<8xf32>
    %59 = vector.shape_cast %58 : vector<8xf32> to vector<8x1xf32>
    %60 = vector.broadcast %59 : vector<8x1xf32> to vector<8x256xf32>
    %61 = arith.subf %57, %60 : vector<8x256xf32>
    %62 = math.exp %61 : vector<8x256xf32>
    %cst_10 = arith.constant dense<0.000000e+00> : vector<8xf32>
    %63 = vector.multi_reduction <add>, %62, %cst_10 [1] : vector<8x256xf32> to vector<8xf32>
    %64 = vector.shape_cast %63 : vector<8xf32> to vector<8x1xf32>
    %65 = math.log %64 : vector<8x1xf32>
    %66 = vector.broadcast %65 : vector<8x1xf32> to vector<8x256xf32>
    %67 = arith.subf %61, %66 : vector<8x256xf32>
    %c0_11 = arith.constant 0 : index
    %c0_12 = arith.constant 0 : index
    %68 = vector.load %arg5[%c0_11, %c0_12] : memref<8x256xf32, #tpu.memory_space<vmem>>, vector<8x256xf32>
    tpu.vector_store %arg5[%c0_11, %c0_12], %67 {strides = array<i32>} : memref<8x256xf32, #tpu.memory_space<vmem>>, vector<8x256xf32>,
    return
  }
  func.func @transform_0(%arg0: i32) -> (i32, i32) {
    %c0_i32 = arith.constant 0 : i32
    %c0_i32_0 = arith.constant 0 : i32
    return %arg0, %c0_i32 : i32, i32
  }
  func.func @transform_1(%arg0: i32) -> (i32, i32) {
    %c0_i32 = arith.constant 0 : i32
    %c0_i32_0 = arith.constant 0 : i32
    %c0_i32_1 = arith.constant 0 : i32
    return %c0_i32, %c0_i32_0 : i32, i32
  }
  func.func @transform_2(%arg0: i32) -> (i32, i32) {
    %c0_i32 = arith.constant 0 : i32
    %c0_i32_0 = arith.constant 0 : i32
    %c0_i32_1 = arith.constant 0 : i32
    return %c0_i32, %c0_i32_0 : i32, i32
  }
  func.func @transform_3(%arg0: i32) -> (i32, i32) {
    %c0_i32 = arith.constant 0 : i32
    %c0_i32_0 = arith.constant 0 : i32
    %c0_i32_1 = arith.constant 0 : i32
    return %c0_i32, %c0_i32_0 : i32, i32
  }
  func.func @transform_4(%arg0: i32) -> (i32, i32) {
    %c0_i32 = arith.constant 0 : i32
    %c0_i32_0 = arith.constant 0 : i32
    return %arg0, %c0_i32 : i32, i32
  }
}

</mosaic_0001>

<bundles_post_ra>
// kernel: tpu_custom_call.1
= control target key start
LH: loop header
LB: loop body
LE: loop exit
PB: predicated region body
PF: predicated region fallthrough
CT: control target
= control target key end

     0   :  { %9 = vsyncpa [#allocation3], 0  ;;  %s1120_s0 = inlined_call_operand.vmem [shape: s32[16,8], index: 0, kind: input, shape index: {}]   ;;  %s1121_s1 = inlined_call_operand.hbm [shape: f32[256,128], index: 1, kind: input, shape index: {}]   ;;  %s1122_s2 = inlined_call_operand.hbm [shape: f32[128,256], index: 2, kind: input, shape index: {}]   ;;  %s1123_s3 = inlined_call_operand.vmem [shape: f32[1,256], index: 3, kind: input, shape index: {}]   ;;  %s1124_s4 = inlined_call_operand.hbm [shape: f32[16,256], index: 4, kind: output, shape index: {}]  }
   0x1   :  { %10 = vsyncpa [#allocation6], 0 }
   0x2   :  { %11 = vsyncpa [#allocation4], 0 }
   0x3   :  { %13 = vsyncpa [#allocation4 + $0x1], 0  ;;  %s964_s15 = smov 0   ;;  %s966_s16 = smov 0  }
   0x4   :  { %s968_s17 = smov 0   ;;  %s970_s18 = smov 0  }
   0x5 LB: > { %s985_s19 = sadd.s32 4294967295, %s921_s18   ;;  %s646_s20 = sadd.s32 4294967294, %s921_s18   ;;  %s921_s18 = sphi %s970_s18, %s1138_s18   ;;  %s917_s17 = sphi %s968_s17, %s1137_s17   ;;  %s913_s16 = sphi %s966_s16, %s1136_s16   ;;  %s909_s15 = sphi %s964_s15, %s1135_s15  }
   0x6   : > { %s989_s21 = sadd.s32 1, %s921_s18   ;;  %s115_s22 = sadd.s32 1, %s917_s17 }
   0x7   : > { %s112_s23 = ssub.s32 %s921_s18, %s989_s21  ;;  %p125_p0 = scmp.ne.s32.totalorder %s917_s17, %s913_s16 }
   0x8   : > { %p113_p1 = scmp.eq.s32.totalorder %s112_s23, 0  ;;  %p126_p2 = scmp.eq.s32.totalorder %s985_s19, 1 }
   0x9   : > { %p131_p3 = scmp.ne.s32.totalorder %s913_s16, %s909_s15  ;;  %p132_p4 = scmp.eq.s32.totalorder %s646_s20, 1 }
   0xa   : > { %s1000_s24 = scalar_select %p113_p1, %s917_s17, %s115_s22  }
   0xb   : > { %p1002_p5 = por %p126_p2, %p125_p0  ;;  %p1006_p6 = por %p132_p4, %p131_p3 }
   0xc   : > { %p647_p7 = scmp.ge.s32.totalorder %s921_s18, 1  ;;  %p139_p8 = scmp.lt.s32.totalorder %s921_s18, 3 }
   0xd   : > { %s1127_s26 = scalar_select %p1006_p6, 1, 0 }
   0xe   : > { %p1125_p9 = scmp.eq.s32.totalorder %s985_s19, 0  ;;  %p1013_p10 = pnand %p647_p7, %p139_p8 }
   0xf   : > { %s923_s28 = smov [#allocation2]   ;;  %s924_s5 = smov [#allocation5]  }
  0x10   : > { %s151_s29 = sshll.u32 %s923_s28, 4  ;;  %p723_p11 = pneg %p1013_p10  ;;  %s152_s29 = int_to_ptr.vmem [resolvable:$true] %s151_s29 }
  0x11   : > { %s164_s6 = sshll.u32 %s924_s5, 4  ;;  %s812_s7 = scalar_lea.vmem %s152_s29, 4096  ;;  %s165_s6 = int_to_ptr.vmem [resolvable:$true] %s164_s6 }
  0x12   : > { %p1021_p12 = pnand %p1125_p9, %p723_p11  ;;  %p813_p0 = scmp.ne.s32.totalorder %s152_s29, %s812_s7 }
  0x13   : > { %p820_p3 = scmp.lt.s32.totalorder %s152_s29, %s152_s29  ;;  %p821_p4 = scmp.lt.s32.totalorder %s812_s7, %s812_s7 }
  0x14   : > { %p803_p13 = pneg %p1021_p12 }
  0x15   : > { %p822_p7 = por %p821_p4, %p820_p3 }
  0x16   : > { %p815_p1 = pnand %p813_p0, %p803_p13 }
  0x18   : > { %p816_p2 = pneg %p815_p1 }
  0x1a   : > { %p823_p8 = pnand %p822_p7, %p816_p2 }
  0x1c   : > { %826 = shalt.err (!%p823_p8)
}
  0x1d   : > { %s925_s8 = smov 128   ;;  %s926_s9 = smov 8  }
  0x1e   : > { %726 = dma.hbm_to_vmem [thread:$0]  (!%p1021_p12), %s1121_s1, 4096, %s152_s29, [#allocation3], %s925_s8, %s925_s8, %s926_s9  }
  0x1f   : > { %s838_s12 = scalar_lea.vmem %s165_s6, 4096  ;;  %p846_p9 = scmp.lt.s32.totalorder %s165_s6, %s165_s6 }
  0x20   : > { %p839_p11 = scmp.ne.s32.totalorder %s165_s6, %s838_s12  ;;  %p847_p6 = scmp.lt.s32.totalorder %s838_s12, %s838_s12 }
  0x22   : > { %p841_p0 = pnand %p839_p11, %p803_p13  ;;  %p848_p3 = por %p847_p6, %p846_p9 }
  0x24   : > { %p842_p1 = pneg %p841_p0 }
  0x26   : > { %p849_p2 = pnand %p848_p3, %p842_p1 }
  0x28   : > { %852 = shalt.err (!%p849_p2)
}
  0x29   : > { %s927_s13 = smov 256   ;;  %s928_s14 = smov 16  }
  0x2a   : > { %729 = dma.hbm_to_vmem [thread:$0]  (!%p1021_p12), %s1122_s2, 4096, %s165_s6, [#allocation6], %s927_s13, %s927_s13, %s928_s14  }
  0x2b   : > { %190 = sbr.rel (%p1013_p10) target bundleno = 932 (0x3a4), region = 36  ;;  %p1130_p4 = scmp.eq.s32.totalorder (!%p1013_p10), %s985_s19, 0 }
  0x30   : > { %896 = dma.done.wait (%p1130_p4), [#allocation3], 4096   ;;  %p1131_p13 = pmov %p1130_p4 }
  0x31   : > { %p1132_p6 = pmov %p1130_p4 }
  0x32   : > { %898 = vsyncadd (%p1131_p13), [#allocation3], 4294963200 }
  0x33   : > { %900 = dma.done.wait (%p1132_p6), [#allocation6], 4096   ;;  %p1133_p9 = pmov %p1130_p4 }
  0x34   : > { %p219_p7 = scmp.lt.s32.totalorder %s985_s19, 1  ;;  %v929_v0 = vmov 2   ;;  %v930_v1 = vmov 0   ;;  %v931_v2 = vmov 0.0   ;;  %v346_v4 = vld [vmem:[#allocation2 + $0xf8] sm:$0xff]  ;;  %v345_v6 = vld [vmem:[#allocation2 + $0xf0] sm:$0xff] }
  0x35   : > { %902 = vsyncadd (%p1133_p9), [#allocation6], 4294963200  ;;  %788 = vset.pattern.permute.xlu1 %v929_v0  ;;  %786 = vset.pattern.permute.xlu0 %v930_v1  ;;  %v330_v5 = vld [vmem:[#allocation2 + $0x78] sm:$0xff]  ;;  %v329_v7 = vld [vmem:[#allocation2 + $0x70] sm:$0xff]  ;;  %v932_v8 = vmov 3   ;;  %v933_v9 = vmov 1  }
  0x36   : > { %s220_s23 = scalar_select %p219_p7, %s985_s19, 1  ;;  %525 = vmatprep.mubr.f32.mxu1 %v931_v2  ;;  %678 = vmatprep.subr.mxu0 %v346_v4  ;;  %v344_v10 = vld [vmem:[#allocation2 + $0xe8] sm:$0xff]  ;;  %v343_v12 = vld [vmem:[#allocation2 + $0xe0] sm:$0xff]  ;;  %v934_v13 = vmov 4   ;;  %v935_v14 = vmov 5   ;;  %v342_v16 = vld [vmem:[#allocation2 + $0xd8] sm:$0xff] }
  0x37   : > { %679 = vmatpush3.msra.mxu0 %v330_v5  ;;  %v328_v11 = vld [vmem:[#allocation2 + $0x68] sm:$0xff]  ;;  %v327_v15 = vld [vmem:[#allocation2 + $0x60] sm:$0xff]  ;;  %v326_v17 = vld [vmem:[#allocation2 + $0x58] sm:$0xff]  ;;  %v936_v20 = vmov 6   ;;  %v937_v24 = vmov 7   ;;  %s216_s7 = sand.u32 1, %s913_s16  }
  0x38   : > { %s655_s27 = sshll.u32 %s220_s23, 3  ;;  %680 = vmatprep.subr.mxu0 %v345_v6  ;;  %v341_v18 = vld [vmem:[#allocation2 + $0xd0] sm:$0xff]  ;;  %v340_v21 = vld [vmem:[#allocation2 + $0xc8] sm:$0xff]  ;;  %v339_v23 = vld [vmem:[#allocation2 + $0xc0] sm:$0xff]  ;;  %v224_v6 = vlaneseq  ;;  %s654_s8 = sshll.u32 %s216_s7, 4 }
  0x39   : > { %s222_s30 = scalar_lea.vmem %s1120_s0, %s655_s27  ;;  %681 = vmatpush3.msra.mxu0 %v329_v7  ;;  %v325_v19 = vld [vmem:[#allocation2 + $0x50] sm:$0xff]  ;;  %v324_v22 = vld [vmem:[#allocation2 + $0x48] sm:$0xff]  ;;  %v323_v25 = vld [vmem:[#allocation2 + $0x40] sm:$0xff]  ;;  %s677_s9 = sshll.u32 %s985_s19, 8 }
  0x3a   : > { %v223_v3 = vld [vmem:[%s222_s30] sm:$0xff]  ;;  %682 = vmatprep.subr.mxu0 %v344_v10  ;;  %v338_v26 = vld [vmem:[#allocation2 + $0xb8] sm:$0xff]  ;;  %v337_v28 = vld [vmem:[#allocation2 + $0xb0] sm:$0xff]  ;;  %v225_v7 = vand.u32 127, %v224_v6  ;;  %s218_s10 = scalar_lea.vmem [#allocation7], %s654_s8  ;;  %s1085_s14 = scalar_lea.hbm %s1124_s4, %s677_s9 }
  0x3b   : > { %250 = vperm.xlu1 %788, %v223_v3   ;;  %228 = vperm.xlu0 %786, %v223_v3   ;;  %v322_v27 = vld [vmem:[#allocation2 + $0x38] sm:$0xff]  ;;  %v321_v29 = vld [vmem:[#allocation2 + $0x30] sm:$0xff]  ;;  %v446_v32 = vld [vmem:[#allocation5 + $0xe8] sm:$0xff]  ;;  %s565_s11 = sshll.u32 %s218_s10, 4  ;;  %s551_s20 = scalar_lea.sflag [#allocation4], %s216_s7  ;;  %s566_s11 = int_to_ptr.vmem [resolvable:$true] %s565_s11 }
  0x3c   : > { %683 = vmatpush3.msra.mxu0 %v328_v11  ;;  %v448_v30 = vld [vmem:[#allocation5 + $0xf8] sm:$0xff]  ;;  %v447_v31 = vld [vmem:[#allocation5 + $0xf0] sm:$0xff]  ;;  %v336_v33 = vld [vmem:[#allocation2 + $0xa8] sm:$0xff]  ;;  %v226_v10 = vadd.s32 128, %v225_v7  ;;  %s853_s22 = scalar_lea.vmem %s566_s11, 256  ;;  %s938_s19 = smov [#allocation7]  }
  0x3d   : > { %684 = vmatprep.subr.mxu0 %v343_v12  ;;  %461 = vmatprep.subr.mxu1 %v448_v30  ;;  %v445_v34 = vld [vmem:[#allocation5 + $0xe0] sm:$0xff]  ;;  %v320_v35 = vld [vmem:[#allocation2 + $0x28] sm:$0xff]  ;;  %v444_v36 = vld [vmem:[#allocation5 + $0xd8] sm:$0xff]  ;;  %p854_p10 = scmp.ne.s32.totalorder %s566_s11, %s853_s22  ;;  %s857_s23 = sshll.u32 %s938_s19, 4  ;;  %s858_s23 = int_to_ptr.vmem [resolvable:$false] %s857_s23 }
  0x3e   : > { %685 = vmatpush3.msra.mxu0 %v327_v15  ;;  %462 = vmatpush1.msra.mxu1 %v447_v31  ;;  %v335_v37 = vld [vmem:[#allocation2 + $0xa0] sm:$0xff]  ;;  %v443_v38 = vld [vmem:[#allocation5 + $0xd0] sm:$0xff]  ;;  %v442_v40 = vld [vmem:[#allocation5 + $0xc8] sm:$0xff]  ;;  %s859_s27 = scalar_lea.vmem %s858_s23, 512  ;;  %p860_p11 = scmp.lt.s32.totalorder %s566_s11, %s858_s23 }
  0x3f   : > { %789 = vset.pattern.permute.xlu1 %v932_v8  ;;  %787 = vset.pattern.permute.xlu0 %v933_v9  ;;  %v319_v39 = vld [vmem:[#allocation2 + $0x20] sm:$0xff]  ;;  %v334_v41 = vld [vmem:[#allocation2 + $0x98] sm:$0xff]  ;;  %v333_v45 = vld [vmem:[#allocation2 + $0x90] sm:$0xff]  ;;  %p855_p12 = pnand %p854_p10, %p1002_p5  ;;  %p861_p0 = scmp.lt.s32.totalorder %s859_s27, %s853_s22 }
  0x40   : > { %261 = vperm.xlu1 %789, %v223_v3   ;;  %239 = vperm.xlu0 %787, %v223_v3   ;;  %v441_v42 = vld [vmem:[#allocation5 + $0xc0] sm:$0xff]  ;;  %v318_v43 = vld [vmem:[#allocation2 + $0x18] sm:$0xff]  ;;  %v439_v46 = vld [vmem:[#allocation5 + $0xb0] sm:$0xff] }
  0x41   : > { %686 = vmatprep.subr.mxu0 %v342_v16  ;;  %463 = vmatprep.subr.mxu1 %v446_v32  ;;  %v440_v44 = vld [vmem:[#allocation5 + $0xb8] sm:$0xff]  ;;  %v317_v47 = vld [vmem:[#allocation2 + $0x10] sm:$0xff]  ;;  %v438_v48 = vld [vmem:[#allocation5 + $0xa8] sm:$0xff]  ;;  %p856_p8 = pneg %p855_p12  ;;  %p862_p1 = por %p861_p0, %p860_p11 }
  0x42   : > { %687 = vmatpush3.msra.mxu0 %v326_v17  ;;  %464 = vmatpush1.msra.mxu1 %v445_v34  ;;  %v332_v49 = vld [vmem:[#allocation2 + $0x88] sm:$0xff]  ;;  %v437_v50 = vld [vmem:[#allocation5 + $0xa0] sm:$0xff]  ;;  %v436_v52 = vld [vmem:[#allocation5 + $0x98] sm:$0xff] }
  0x43   : > { %688 = vmatprep.subr.mxu0 %v341_v18  ;;  %465 = vmatprep.subr.mxu1 %v444_v36  ;;  %v316_v51 = vld [vmem:[#allocation2 + $0x8] sm:$0xff]  ;;  %v331_v53 = vld [vmem:[#allocation2 + $0x80] sm:$0xff]  ;;  %v435_v54 = vld [vmem:[#allocation5 + $0x90] sm:$0xff]  ;;  %p863_p3 = pnand %p862_p1, %p856_p8 }
  0x44   : > { %790 = vset.pattern.permute.xlu1 %v934_v13  ;;  %791 = vset.pattern.permute.xlu0 %v935_v14  ;;  %v315_v55 = vld [vmem:[#allocation2] sm:$0xff]  ;;  %v434_v56 = vld [vmem:[#allocation5 + $0x88] sm:$0xff]  ;;  %v432_v58 = vld [vmem:[#allocation5 + $0x78] sm:$0xff] }
  0x45   : > { %272 = vperm.xlu1 %790, %v223_v3   ;;  %283 = vperm.xlu0 %791, %v223_v3   ;;  %v433_v57 = vld [vmem:[#allocation5 + $0x80] sm:$0xff]  ;;  %v431_v59 = vld [vmem:[#allocation5 + $0x70] sm:$0xff]  ;;  %v430_v60 = vld [vmem:[#allocation5 + $0x68] sm:$0xff] }
  0x46   : > { %689 = vmatpush3.msra.mxu0 %v325_v19  ;;  %466 = vmatpush1.msra.mxu1 %v443_v38  ;;  %v429_v61 = vld [vmem:[#allocation5 + $0x60] sm:$0xff]  ;;  %v428_v62 = vld [vmem:[#allocation5 + $0x58] sm:$0xff]  ;;  %v427_v63 = vld [vmem:[#allocation5 + $0x50] sm:$0xff] }
  0x47   : > { %690 = vmatprep.subr.mxu0 %v340_v21  ;;  %467 = vmatprep.subr.mxu1 %v442_v40  ;;  %v426_v0 = vld [vmem:[#allocation5 + $0x48] sm:$0xff]  ;;  %v425_v1 = vld [vmem:[#allocation5 + $0x40] sm:$0xff]  ;;  %v423_v4 = vld [vmem:[#allocation5 + $0x30] sm:$0xff] }
  0x48   : > { %691 = vmatpush3.msra.mxu0 %v324_v22  ;;  %468 = vmatpush1.msra.mxu1 %v441_v42  ;;  %v422_v5 = vld [vmem:[#allocation5 + $0x28] sm:$0xff] }
  0x49   : > { %792 = vset.pattern.permute.xlu1 %v936_v20  ;;  %794 = vset.pattern.permute.xlu0 %v937_v24 }
  0x4a   : > { %294 = vperm.xlu1 %792, %v223_v3   ;;  %692 = vmatprep.subr.mxu0 %v339_v23 }
  0x4b   : > { %693 = vmatpush3.msra.mxu0 %v323_v25  ;;  %469 = vmatprep.subr.mxu1 %v440_v44 }
  0x4c   : > { %694 = vmatprep.subr.mxu0 %v338_v26  ;;  %470 = vmatpush1.msra.mxu1 %v439_v46 }
  0x4d   : > { %695 = vmatpush3.msra.mxu0 %v322_v27  ;;  %471 = vmatprep.subr.mxu1 %v438_v48  ;;  %v420_v48 = vld [vmem:[#allocation5 + $0x18] sm:$0xff] }
  0x4e   : > { %793 = vset.pattern.permute.xlu1 %v937_v24  ;;  %696 = vmatprep.subr.mxu0 %v337_v28 }
  0x4f   : > { %305 = vperm.xlu1 %793, %v223_v3   ;;  %697 = vmatpush3.msra.mxu0 %v321_v29  ;;  %v424_v3 = vld [vmem:[#allocation5 + $0x38] sm:$0xff] }
  0x50   : > { %698 = vmatprep.subr.mxu0 %v336_v33  ;;  %472 = vmatpush1.msra.mxu1 %v437_v50  ;;  %v418_v50 = vld [vmem:[#allocation5 + $0x8] sm:$0xff] }
  0x51   : > { %699 = vmatpush3.msra.mxu0 %v320_v35  ;;  %473 = vmatprep.subr.mxu1 %v436_v52 }
  0x52   : > { %700 = vmatprep.subr.mxu0 %v335_v37  ;;  %474 = vmatpush1.msra.mxu1 %v435_v54 }
  0x53   : > { %701 = vmatpush3.msra.mxu0 %v319_v39  ;;  %475 = vmatprep.subr.mxu1 %v434_v56 }
  0x54   : > { %702 = vmatprep.subr.mxu0 %v334_v41  ;;  %476 = vmatpush1.msra.mxu1 %v433_v57  ;;  %v449_v57 = vld [vmem:[%s1123_s3] sm:$0x3] }
  0x55   : > { %703 = vmatpush3.msra.mxu0 %v318_v43  ;;  %477 = vmatprep.subr.mxu1 %v432_v58 }
  0x56   : > { %704 = vmatprep.subr.mxu0 %v333_v45  ;;  %478 = vmatpush1.msra.mxu1 %v431_v59 }
  0x57   : > { %705 = vmatpush3.msra.mxu0 %v317_v47  ;;  %479 = vmatprep.subr.mxu1 %v430_v60  ;;  %v421_v47 = vld [vmem:[#allocation5 + $0x20] sm:$0xff] }
  0x58   : > { %706 = vmatprep.subr.mxu0 %v332_v49  ;;  %480 = vmatpush1.msra.mxu1 %v429_v61  ;;  %v419_v49 = vld [vmem:[#allocation5 + $0x10] sm:$0xff] }
  0x59   : > { %707 = vmatpush3.msra.mxu0 %v316_v51  ;;  %481 = vmatprep.subr.mxu1 %v428_v62  ;;  %v417_v51 = vld [vmem:[#allocation5] sm:$0xff] }
  0x5a   : > { %708 = vmatprep.subr.mxu0 %v331_v53  ;;  %482 = vmatpush1.msra.mxu1 %v427_v63 }
  0x5b   : > { %709 = vmatpush3.msra.mxu0 %v315_v55  ;;  %483 = vmatprep.subr.mxu1 %v426_v0 }
  0x5c   : > { %484 = vmatpush1.msra.mxu1 %v425_v1 }
  0x5d   : > { %485 = vmatprep.subr.mxu1 %v424_v3 }
  0x5e   : > { %486 = vmatpush1.msra.mxu1 %v423_v4 }
  0x5f   : > { %487 = vmatprep.subr.mxu1 %v422_v5 }
  0x60   : > { %488 = vmatpush1.msra.mxu1 %v421_v47 }
  0x61   : > { %489 = vmatprep.subr.mxu1 %v420_v48 }
  0x62   : > { %490 = vmatpush1.msra.mxu1 %v419_v49 }
  0x63   : > { %491 = vmatprep.subr.mxu1 %v418_v50 }
  0x64   : > { %492 = vmatpush1.msra.mxu1 %v417_v51 }
  0xb6   : > { %v251_v8 = vpop.permute.xlu1 %250  ;;  %v229_v9 = vpop.permute.xlu0 %228 }
  0xb7   : > { %vm230_vm0 = vcmp.eq.s32.totalorder %v225_v7, %v229_v9  ;;  %vm231_vm1 = vcmp.eq.s32.totalorder %v226_v10, %v229_v9  ;;  %vm252_vm2 = vcmp.eq.s32.totalorder %v225_v7, %v251_v8  ;;  %vm253_vm3 = vcmp.eq.s32.totalorder %v226_v10, %v251_v8 }
  0xb8   : > { %v656_v13 = vsel %vm230_vm0, 1.0, %v931_v2  ;;  %v657_v14 = vsel %vm231_vm1, 1.0, %v931_v2  ;;  %v660_v19 = vsel %vm252_vm2, 1.0, %v931_v2  ;;  %v661_v20 = vsel %vm253_vm3, 1.0, %v931_v2 }
  0xbb   : > { %v262_v11 = vpop.permute.xlu1 %261  ;;  %v240_v12 = vpop.permute.xlu0 %239 }
  0xbc   : > { %vm241_vm4 = vcmp.eq.s32.totalorder %v225_v7, %v240_v12  ;;  %vm242_vm5 = vcmp.eq.s32.totalorder %v226_v10, %v240_v12  ;;  %vm263_vm6 = vcmp.eq.s32.totalorder %v225_v7, %v262_v11  ;;  %vm264_vm7 = vcmp.eq.s32.totalorder %v226_v10, %v262_v11 }
  0xbd   : > { %v658_v15 = vsel %vm241_vm4, 1.0, %v931_v2  ;;  %v659_v16 = vsel %vm242_vm5, 1.0, %v931_v2  ;;  %v662_v21 = vsel %vm263_vm6, 1.0, %v931_v2  ;;  %v663_v22 = vsel %vm264_vm7, 1.0, %v931_v2 }
  0xbe   : > { %v247_v17 = vadd.f32 %v658_v15, %v656_v13  ;;  %v248_v18 = vadd.f32 %v659_v16, %v657_v14 }
  0xc0   : > { %v258_v23 = vadd.f32 %v660_v19, %v247_v17  ;;  %v259_v24 = vadd.f32 %v661_v20, %v248_v18  ;;  %v273_v25 = vpop.permute.xlu1 %272  ;;  %v284_v26 = vpop.permute.xlu0 %283 }
  0xc1   : > { %vm274_vm8 = vcmp.eq.s32.totalorder %v225_v7, %v273_v25  ;;  %vm275_vm9 = vcmp.eq.s32.totalorder %v226_v10, %v273_v25  ;;  %vm285_vm10 = vcmp.eq.s32.totalorder %v225_v7, %v284_v26  ;;  %vm286_vm11 = vcmp.eq.s32.totalorder %v226_v10, %v284_v26 }
  0xc2   : > { %v269_v27 = vadd.f32 %v662_v21, %v258_v23  ;;  %v270_v28 = vadd.f32 %v663_v22, %v259_v24  ;;  %v664_v29 = vsel %vm274_vm8, 1.0, %v931_v2  ;;  %v665_v30 = vsel %vm275_vm9, 1.0, %v931_v2 }
  0xc3   : > { %v666_v33 = vsel %vm285_vm10, 1.0, %v931_v2  ;;  %v667_v34 = vsel %vm286_vm11, 1.0, %v931_v2 }
  0xc4   : > { %v280_v31 = vadd.f32 %v664_v29, %v269_v27  ;;  %v281_v32 = vadd.f32 %v665_v30, %v270_v28 }
  0xc5   : > { %v295_v35 = vpop.permute.xlu1 %294 }
  0xc6   : > { %vm296_vm12 = vcmp.eq.s32.totalorder %v225_v7, %v295_v35  ;;  %vm297_vm13 = vcmp.eq.s32.totalorder %v226_v10, %v295_v35  ;;  %v291_v36 = vadd.f32 %v666_v33, %v280_v31  ;;  %v292_v37 = vadd.f32 %v667_v34, %v281_v32 }
  0xc7   : > { %v668_v38 = vsel %vm296_vm12, 1.0, %v931_v2  ;;  %v669_v39 = vsel %vm297_vm13, 1.0, %v931_v2 }
  0xc8   : > { %v302_v41 = vadd.f32 %v668_v38, %v291_v36  ;;  %v303_v42 = vadd.f32 %v669_v39, %v292_v37 }
  0xca   : > { %v306_v40 = vpop.permute.xlu1 %305 }
  0xcb   : > { %vm307_vm14 = vcmp.eq.s32.totalorder %v225_v7, %v306_v40  ;;  %vm308_vm15 = vcmp.eq.s32.totalorder %v226_v10, %v306_v40 }
  0xcc   : > { %v670_v43 = vsel %vm307_vm14, 1.0, %v931_v2  ;;  %v671_v44 = vsel %vm308_vm15, 1.0, %v931_v2  ;;  %v452_v2 = vshrl.u32 %v224_v6, 7 }
  0xcd   : > { %v313_v45 = vadd.f32 %v670_v43, %v302_v41  ;;  %v314_v46 = vadd.f32 %v671_v44, %v303_v42 }
  0xce   : > { %v453_v55 = vsub.s32 0, %v452_v2  ;;  %v457_v56 = vsub.s32 1, %v452_v2 }
  0xcf   : > { %411 = vmatprep.mubr.f32.mxu0 %v314_v46 }
  0xd0   : > { %412 = vmatmul.mubr.f32.vlgmr.msra.gmra.mxu0 %v313_v45  ;;  %v454_v58 = vrot.slane %v449_v57, %v453_v55  ;;  %v458_v59 = vrot.slane %v449_v57, %v457_v56 }
 0x190   : > { %v710_v52 = vpop.f32.mrf.mxu0 }
 0x192   : > { %v711_v53 = vpop.f32.mrf.mxu0 }
 0x193   : > { %v712_v54 = vadd.f32 %v711_v53, %v710_v52 }
 0x195   : > { %526 = vmatmul.mubr.f32.vlgmr.msra.gmra.mxu1 %v712_v54 }
 0x255   : > { %v527_v60 = vpop.f32.mrf.mxu1 }
 0x256   : > { %v528_v62 = vadd.f32 %v527_v60, %v454_v58 }
 0x257   : > { %v529_v61 = vpop.f32.mrf.mxu1 }
 0x258   : > { %v530_v63 = vadd.f32 %v529_v61, %v458_v59 }
 0x25a   : > { %v532_v0 = vmax.f32 %v528_v62, %v530_v63 }
 0x25c   : > { %533 = vmax.xlane.f32.xlu0 %v532_v0 }
 0x2e5   : > { %v534_v1 = vpop.xlane.xlu0 %533 }
 0x2e6   : > { %v535_v3 = vsub.f32 %v528_v62, %v534_v1  ;;  %v536_v4 = vsub.f32 %v530_v63, %v534_v1 }
 0x2e8   : > { %v537_v5 = vmul.f32 1.442695, %v535_v3  ;;  %v539_v6 = vmul.f32 1.442695, %v536_v4 }
 0x2ea   : > { %795 = vpow2.f32 %v537_v5 }
 0x2eb   : > { %797 = vpow2.f32 %v539_v6 }
 0x2f7   : > { %v796_v7 = vpop.eup %795 }
 0x2f8   : > { %v798_v8 = vpop.eup %797 }
 0x2f9   : > { %v541_v9 = vadd.f32 %v798_v8, %v796_v7 }
 0x2fb   : > { %542 = vadd.xlane.f32.xlu1 %v541_v9 }
 0x384   : > { %v543_v10 = vpop.xlane.xlu1 %542 }
 0x385   : > { %799 = vlog2.f32 %v543_v10 }
 0x392   : > { %v800_v11 = vpop.eup %799 }
 0x393   : > { %v545_v12 = vmul.f32 0.6931472, %v800_v11 }
 0x395   : > { %v546_v13 = vsub.f32 %v535_v3, %v545_v12  ;;  %v547_v14 = vsub.f32 %v536_v4, %v545_v12 }
 0x397   : > { %548 = vst [vmem:[%s218_s10] sm:$0xff] %v546_v13  ;;  %549 = vst [vmem:[%s218_s10 + $0x8] sm:$0xff] %v547_v14 }
 0x398   : > { %866 = shalt.err (!%p863_p3)
}
 0x399   : > { %s867_s28 = scalar_lea.hbm %s1085_s14, 256  ;;  %s871_s5 = scalar_lea.hbm %s1124_s4, 512 }
 0x39a   : > { %p868_p2 = scmp.ne.s32.totalorder %s1085_s14, %s867_s28  ;;  %p872_p6 = scmp.lt.s32.totalorder %s1085_s14, %s1124_s4 }
 0x39b   : > { %p873_p9 = scmp.lt.s32.totalorder %s871_s5, %s867_s28 }
 0x39c   : > { %p869_p4 = pnand %p868_p2, %p1002_p5 }
 0x39d   : > { %p874_p7 = por %p873_p9, %p872_p6 }
 0x39e   : > { %p870_p13 = pneg %p869_p4 }
 0x3a0   : > { %p875_p10 = pnand %p874_p7, %p870_p13 }
 0x3a2   : > { %878 = shalt.err (!%p875_p10)
}
 0x3a3   : > { %721 = dma.vmem_to_hbm [thread:$0]  (%p1002_p5), %s566_s11, 256, %s1085_s14, %s551_s20  }
 0x3a4 PF: > { %p738_p12 = scmp.ge.s32.totalorder %s921_s18, 2  ;;  %s577_s8 = sand.u32 1, %s909_s15  }
 0x3a5   : > { %p1134_p8 = scmp.ne.s32.totalorder %s1127_s26, 0  ;;  %s578_s9 = scalar_lea.sflag [#allocation4], %s577_s8 }
 0x3a7   : > { %p731_p11 = pnand %p738_p12, %p1134_p8 }
 0x3a9   : > { %p732_p0 = pneg %p731_p11 }
 0x3ab   : > { %904 = dma.done.wait (%p732_p0), %s578_s9, 256  }
 0x3ac   : > { %906 = vsyncadd (%p732_p0), %s578_s9, 4294967040  ;;  %p16_p1 = scmp.ge.s32.totalorder %s989_s21, 4   ;;  %s1135_s15 = smov %s913_s16 }
 0x3ad   : > { %s1136_s16 = smov %s917_s17  ;;  %s1137_s17 = smov %s1000_s24 }
 0x3ae   : > { %s1138_s18 = smov %s989_s21  ;;  %18 = sbr.rel (!%p16_p1) target bundleno = 5 (0x5), region = 80 }
 0x3b3   :  { %583 = vsyncpa [#allocation3], 1 }
 0x3b4   :  { %585 = vsyncpa [#allocation3 + $0x1], 1 }
 0x3b5   :  { %586 = vsyncpa [#allocation6], 1 }
 0x3b6   :  { %587 = vsyncpa [#allocation4], 1 }
 0x3b7   :  { %589 = vsyncpa [#allocation4 + $0x1], 1 }

</bundles_post_ra>
